<compile_context>
chip_gen: v7x
topology: tpu7x:2x2x1
jax: 0.10.0
libtpu: 0.0.40
codegen_flags: <defaults>
</compile_context>

<pallas_src>
import math

import jax
import jax.numpy as jnp
from jax.experimental import pallas as pl
from jax.experimental.pallas import tpu as pltpu


def _add_pe_kernel(x_ref, inv_freq_ref, phase_ref, o_ref):
    """o = x + sin(pos * inv_freq + phase), pos = absolute sequence position.

    x_ref / o_ref: (block_s, B*D)   current block of the flattened input/output
    inv_freq_ref : (1, B*D)         per-lane frequency (div_term tiled over batch)
    phase_ref    : (1, B*D)         0 on even d (sin lanes), pi/2 on odd d (cos lanes)
    """
    block_s, bd = x_ref.shape
    i = pl.program_id(0)

    # Absolute sequence position of every row in this block (sublane iota).
    row = jax.lax.broadcasted_iota(jnp.int32, (block_s, bd), 0)
    pos = (row + i * block_s).astype(jnp.float32)

    # pe[pos, d] = sin(pos * div_term[d//2] + (pi/2 if d odd else 0))
    #            = sin / cos of the PyTorch buffer formula.  sin -> EUP (free slot).
    pe = jnp.sin(pos * inv_freq_ref[...] + phase_ref[...])

    o_ref[...] = x_ref[...] + pe.astype(o_ref.dtype)


def make_pe_buffer(d_model: int, max_len: int = 5000, dtype=jnp.float32):
    """Reference positional-encoding buffer, shape (max_len, 1, d_model)."""
    position = jnp.arange(0, max_len, dtype=jnp.float32)[:, None]              # (L, 1)
    div_term = jnp.exp(
        jnp.arange(0, d_model, 2, dtype=jnp.float32) * (-math.log(10000.0) / d_model)
    )                                                                            # (D/2,)
    angles = position * div_term                                                 # (L, D/2)
    pe = jnp.zeros((max_len, d_model), dtype=jnp.float32)
    pe = pe.at[:, 0::2].set(jnp.sin(angles))
    pe = pe.at[:, 1::2].set(jnp.cos(angles))
    return pe[:, None, :].astype(dtype)                                          # (L, 1, D)


def _pick_block_s(seq_len: int, row_bytes: int, target_bytes: int = 2 << 20) -> int:
    """Largest multiple-of-8 sequence block with <= ~target_bytes of x per block.

    Prefers >=2 grid steps (so the seq axis can shard across v7x's 2 TensorCores)
    while keeping the per-step overhead (~0.35 us) negligible.
    """
    if seq_len <= 8:
        return seq_len                      # full-extent block is always legal
    rows_for_target = max(8, (target_bytes // max(row_bytes, 1)) // 8 * 8)
    padded_seq = ((seq_len + 7) // 8) * 8
    block = min(rows_for_target, padded_seq)
    if block >= seq_len:                    # would be a single grid step
        block = max(8, ((padded_seq // 2 + 7) // 8) * 8)
    return block


def positional_encoding_forward(x: jax.Array, *, max_len: int = 5000) -> jax.Array:
    """x: (S, B, D).  Returns x + pe[:S] broadcast over batch (dropout = eval mode)."""
    S, B, D = x.shape
    assert S <= max_len, "sequence longer than max_len (matches PyTorch buffer limit)"
    bd = B * D

    # Per-lane constants of the pe formula, tiled over the batch axis of the
    # flattened (S, B*D) layout.  Tiny (1, B*D) f32 rows; their block index is
    # constant across the grid so the pipeline fetches them once.
    d_idx = jnp.arange(D, dtype=jnp.int32)
    div_term = jnp.exp(
        (2 * (d_idx // 2)).astype(jnp.float32) * (-math.log(10000.0) / D)
    )                                                           # div_term[d//2], per d
    phase = jnp.where(d_idx % 2 == 1, jnp.float32(0.5 * math.pi), jnp.float32(0.0))
    inv_freq_row = jnp.tile(div_term, (B,)).reshape(1, bd)
    phase_row = jnp.tile(phase, (B,)).reshape(1, bd)

    # Free reshape (x is row-major): lane-dense last dim, sequence on sublanes.
    x2 = x.reshape(S, bd)
    row_bytes = bd * x2.dtype.itemsize
    block_s = _pick_block_s(S, row_bytes)
    grid = (pl.cdiv(S, block_s),)

    out = pl.pallas_call(
        _add_pe_kernel,
        out_shape=jax.ShapeDtypeStruct((S, bd), x.dtype),
        grid_spec=pltpu.PrefetchScalarGridSpec(
            num_scalar_prefetch=0,
            grid=grid,
            in_specs=[
                pl.BlockSpec((block_s, bd), lambda i: (i, 0)),   # x block
                pl.BlockSpec((1, bd), lambda i: (0, 0)),         # inv_freq (fetched once)
                pl.BlockSpec((1, bd), lambda i: (0, 0)),         # phase    (fetched once)
            ],
            out_specs=pl.BlockSpec((block_s, bd), lambda i: (i, 0)),
        ),
        compiler_params=pltpu.CompilerParams(
            dimension_semantics=("parallel",),
            # Raise v5e's 16 MiB default scoped VMEM; stay well under v7x's 64 MiB.
            vmem_limit_bytes=48 * 1024 * 1024,
        ),
    )(x2, inv_freq_row, phase_row)

    # TODO(synk): dropout is identity here (eval mode).
    return out.reshape(S, B, D)


if __name__ == "__main__":
    key = jax.random.PRNGKey(0)

    seq_len, batch, d_model = 8, 2, 32
    max_len = 64  # small deterministic buffer for the reference check

    x = jax.random.normal(key, (seq_len, batch, d_model), dtype=jnp.float32)

    out = positional_encoding_forward(x, max_len=max_len)
    out = jax.block_until_ready(out)

    # Reference: pure-JAX mirror of the PyTorch forward (eval mode).
    pe = make_pe_buffer(d_model, max_len=max_len, dtype=jnp.float32)
    ref = x + pe[:seq_len]

    assert out.shape == (seq_len, batch, d_model)
    assert jnp.allclose(out, ref, atol=1e-5, rtol=1e-5), "mismatch vs reference"

    print("KERNEL_OK")
</pallas_src>

<mosaic_0001>
module attributes {stable_mosaic.version = 11 : i64} {
  func.func @_add_pe_kernel(%arg0: i32, %arg1: memref<8x64xf32, #tpu.memory_space<vmem>>, %arg2: memref<1x64xf32, #tpu.memory_space<vmem>>, %arg3: memref<1x64xf32, #tpu.memory_space<vmem>>, %arg4: memref<8x64xf32, #tpu.memory_space<vmem>>) attributes {dimension_semantics = [#tpu.dimension_semantics<parallel>], iteration_bounds = array<i64: 1>, scalar_prefetch = 0 : i64, scratch_operands = 0 : i64, tpu.core_type = #tpu.core_type<tc>, window_params = [{transform_indices = @transform_0, window_bounds = array<i64: 8, 64>}, {pipeline_mode = #tpu.pipeline_mode<synchronous>, transform_indices = @transform_1, window_bounds = array<i64: 1, 64>}, {pipeline_mode = #tpu.pipeline_mode<synchronous>, transform_indices = @transform_2, window_bounds = array<i64: 1, 64>}, {transform_indices = @transform_3, window_bounds = array<i64: 8, 64>}]} {
    %0 = tpu.iota {dimensions = array<i32: 0>} : vector<8x64xi32>
    %c8_i32 = arith.constant 8 : i32
    %1 = arith.muli %arg0, %c8_i32 : i32
    %2 = vector.broadcast %1 : i32 to vector<8x64xi32>
    %3 = arith.addi %0, %2 : vector<8x64xi32>
    %4 = arith.sitofp %3 : vector<8x64xi32> to vector<8x64xf32>
    %c0 = arith.constant 0 : index
    %c0_0 = arith.constant 0 : index
    %5 = vector.load %arg2[%c0, %c0_0] : memref<1x64xf32, #tpu.memory_space<vmem>>, vector<1x64xf32>
    %6 = vector.broadcast %5 : vector<1x64xf32> to vector<8x64xf32>
    %7 = arith.mulf %4, %6 : vector<8x64xf32>
    %c0_1 = arith.constant 0 : index
    %c0_2 = arith.constant 0 : index
    %8 = vector.load %arg3[%c0_1, %c0_2] : memref<1x64xf32, #tpu.memory_space<vmem>>, vector<1x64xf32>
    %9 = vector.broadcast %8 : vector<1x64xf32> to vector<8x64xf32>
    %10 = arith.addf %7, %9 : vector<8x64xf32>
    %11 = math.sin %10 : vector<8x64xf32>
    %c0_3 = arith.constant 0 : index
    %c0_4 = arith.constant 0 : index
    %12 = vector.load %arg1[%c0_3, %c0_4] : memref<8x64xf32, #tpu.memory_space<vmem>>, vector<8x64xf32>
    %13 = arith.addf %12, %11 : vector<8x64xf32>
    %c0_5 = arith.constant 0 : index
    %c0_6 = arith.constant 0 : index
    %14 = vector.load %arg4[%c0_5, %c0_6] : memref<8x64xf32, #tpu.memory_space<vmem>>, vector<8x64xf32>
    tpu.vector_store %arg4[%c0_5, %c0_6], %13 {strides = array<i32>} : memref<8x64xf32, #tpu.memory_space<vmem>>, vector<8x64xf32>,
    return
  }
  func.func @transform_0(%arg0: i32) -> (i32, i32) {
    %c0_i32 = arith.constant 0 : i32
    %c0_i32_0 = arith.constant 0 : i32
    return %arg0, %c0_i32 : i32, i32
  }
  func.func @transform_1(%arg0: i32) -> (i32, i32) {
    %c0_i32 = arith.constant 0 : i32
    %c0_i32_0 = arith.constant 0 : i32
    %c0_i32_1 = arith.constant 0 : i32
    return %c0_i32, %c0_i32_0 : i32, i32
  }
  func.func @transform_2(%arg0: i32) -> (i32, i32) {
    %c0_i32 = arith.constant 0 : i32
    %c0_i32_0 = arith.constant 0 : i32
    %c0_i32_1 = arith.constant 0 : i32
    return %c0_i32, %c0_i32_0 : i32, i32
  }
  func.func @transform_3(%arg0: i32) -> (i32, i32) {
    %c0_i32 = arith.constant 0 : i32
    %c0_i32_0 = arith.constant 0 : i32
    return %arg0, %c0_i32 : i32, i32
  }
}

</mosaic_0001>

<bundles_post_ra>
// kernel: tpu_custom_call.1
= control target key start
LH: loop header
LB: loop body
LE: loop exit
PB: predicated region body
PF: predicated region fallthrough
CT: control target
= control target key end

     0   :  { %8 = vsyncpa [#allocation3], 0  ;;  %s321_s0 = inlined_call_operand.hbm [shape: f32[8,64], index: 0, kind: input, shape index: {}]   ;;  %s322_s1 = inlined_call_operand.vmem [shape: f32[1,64], index: 1, kind: input, shape index: {}]   ;;  %s323_s2 = inlined_call_operand.vmem [shape: f32[1,64], index: 2, kind: input, shape index: {}]   ;;  %s324_s3 = inlined_call_operand.hbm [shape: f32[8,64], index: 3, kind: output, shape index: {}]  }
   0x1   :  { %9 = vsyncpa [#allocation4], 0  ;;  %s242_s12 = smov [#allocation2]   ;;  %s194_s16 = scalar_lea.hbm %s321_s0, 128 }
   0x2   :  { %s16_s13 = sshll.u32 %s242_s12, 4  ;;  %p195_p0 = scmp.ne.s32.totalorder %s321_s0, %s194_s16  ;;  %s17_s13 = int_to_ptr.vmem [resolvable:$true] %s16_s13 }
   0x3   :  { %p198_p1 = scmp.lt.u32.totalorder %s194_s16, %s321_s0 }
   0x5   :  { %p200_p2 = pnand %p198_p1, %p195_p0 }
   0x7   :  { %203 = shalt.err (!%p200_p2)
}
   0x8   :  { %s204_s21 = scalar_lea.vmem %s17_s13, 128  ;;  %p209_p4 = scmp.lt.s32.totalorder %s17_s13, %s17_s13 }
   0x9   :  { %p205_p3 = scmp.ne.s32.totalorder %s17_s13, %s204_s21  ;;  %p210_p5 = scmp.lt.s32.totalorder %s204_s21, %s204_s21 }
   0xb   :  { %p211_p6 = por %p210_p5, %p209_p4 }
   0xd   :  { %p212_p7 = pnand %p211_p6, %p205_p3 }
   0xf   :  { %215 = shalt.err (!%p212_p7)
}
  0x10   :  { %19 = dma.hbm_to_vmem [thread:$0]  %s321_s0, 128, %s17_s13, [#allocation3]  }
  0x11   :  { %238 = dma.done.wait [#allocation3], 128  }
  0x12   :  { %239 = vsyncadd [#allocation3], 4294967168  ;;  %v27_v0 = vlaneseq  ;;  %v172_v3 = vld [vmem:[%s322_s1] ss:$0 sm:$0xff]  ;;  %v243_v18 = vmov 683565275  }
  0x13   :  { %v173_v4 = vld [vmem:[%s323_s2] ss:$0 sm:$0xff]  ;;  %v244_v20 = vmov 2475754826   ;;  %v245_v22 = vmov 2131351028  }
  0x14   :  { %v28_v1 = vshrl.u32 %v27_v0, 7  ;;  %v246_v24 = vmov 2102212464   ;;  %v247_v26 = vmov 920167782   ;;  %s249_s0 = smov [#allocation5]  }
  0x15   :  { %v248_v33 = vmov 1326507024   ;;  %s163_s1 = sshll.u32 %s249_s0, 4  ;;  %vm155_vm13 = vcmask 523264   ;;  %s164_s1 = int_to_ptr.vmem [resolvable:$true] %s163_s1 }
  0x16   :  { %v32_v2 = vcvt.s32.f32 %v28_v1  ;;  %s216_s2 = scalar_lea.vmem %s164_s1, 128  ;;  %p221_p9 = scmp.lt.s32.totalorder %s164_s1, %s164_s1 }
  0x17   :  { %p217_p8 = scmp.ne.s32.totalorder %s164_s1, %s216_s2  ;;  %p222_p10 = scmp.lt.s32.totalorder %s216_s2, %s216_s2 }
  0x18   :  { %v40_v5 = vmul.f32 %v172_v3, %v32_v2 }
  0x19   :  { %p223_p11 = por %p222_p10, %p221_p9 }
  0x1a   :  { %v288_v6 = vadd.f32 %v173_v4, %v40_v5 }
  0x1b   :  { %p224_p12 = pnand %p223_p11, %p217_p8 }
  0x1c   :  { %v52_v7 = vand.u32 2139095040, %v288_v6  ;;  %v49_v9 = vand.u32 2147483647, %v288_v6  ;;  %vm51_vm7 = vcmp.lt.s32.totalorder %v288_v6, 0  ;;  %vm141_vm12 = vweird.f32 %v288_v6 }
  0x1e   :  { %v53_v8 = vshrl.u32 %v52_v7, 23  ;;  %v56_v12 = vand.u32 8388607, %v49_v9  ;;  %vm50_vm8 = vcmp.le.f32.partialorder %v49_v9, 0.7853982 }
  0x20   :  { %v174_v10 = vadd.s32 4294967169, %v53_v8  ;;  %v57_v15 = vor.u32 8388608, %v56_v12 }
  0x22   :  { %v59_v11 = vadd.s32 1, %v174_v10  ;;  %v97_v35 = vshll.u32 %v57_v15, 8 }
  0x24   :  { %vm60_vm0 = vcmp.gt.s32.totalorder %v59_v11, 0 }
  0x25   :  { %v61_v13 = vsel %vm60_vm0, %v59_v11, 0 }
  0x26   :  { %v63_v14 = vand.u32 31, %v61_v13  ;;  %v62_v16 = vshrl.u32 %v61_v13, 5 }
  0x28   :  { %v64_v17 = vsub.s32 32, %v63_v14  ;;  %v66_v19 = vshll.u32 %v243_v18, %v63_v14  ;;  %v69_v21 = vshll.u32 %v244_v20, %v63_v14  ;;  %v72_v23 = vshll.u32 %v245_v22, %v63_v14 }
  0x29   :  { %v75_v25 = vshll.u32 %v246_v24, %v63_v14  ;;  %v78_v27 = vshll.u32 %v247_v26, %v63_v14  ;;  %vm81_vm1 = vcmp.lt.s32.totalorder %v62_v16, 1  ;;  %vm84_vm2 = vcmp.lt.s32.totalorder %v62_v16, 4 }
  0x2a   :  { %v65_v28 = vshrl.u32 %v243_v18, %v64_v17  ;;  %v67_v29 = vshrl.u32 %v244_v20, %v64_v17  ;;  %v70_v30 = vshrl.u32 %v245_v22, %v64_v17  ;;  %v73_v31 = vshrl.u32 %v246_v24, %v64_v17 }
  0x2b   :  { %v76_v32 = vshrl.u32 %v247_v26, %v64_v17  ;;  %v79_v34 = vshrl.u32 %v248_v33, %v64_v17  ;;  %vm82_vm3 = vcmp.lt.s32.totalorder %v62_v16, 2  ;;  %vm83_vm4 = vcmp.lt.s32.totalorder %v62_v16, 3  ;;  %v153_v33 = vld [vmem:[#allocation2] sm:$0xff] }
  0x2c   :  { %v68_v36 = vor.u32 %v67_v29, %v66_v19  ;;  %v71_v37 = vor.u32 %v70_v30, %v69_v21  ;;  %v74_v38 = vor.u32 %v73_v31, %v72_v23 }
  0x2d   :  { %v77_v39 = vor.u32 %v76_v32, %v75_v25  ;;  %v80_v40 = vor.u32 %v79_v34, %v78_v27 }
  0x2e   :  { %v85_v41 = vsel %vm81_vm1, %v65_v28, %v68_v36  ;;  %v86_v42 = vsel %vm84_vm2, %v74_v38, 2102212464  ;;  %v89_v43 = vsel %vm81_vm1, %v68_v36, %v71_v37  ;;  %v93_v44 = vsel %vm81_vm1, %v71_v37, %v74_v38 }
  0x2f   :  { %v87_v45 = vsel %vm83_vm4, %v71_v37, %v86_v42  ;;  %v90_v46 = vsel %vm84_vm2, %v77_v39, 920167782  ;;  %v94_v47 = vsel %vm84_vm2, %v80_v40, 1326507024 }
  0x30   :  { %v91_v48 = vsel %vm83_vm4, %v74_v38, %v90_v46  ;;  %v95_v49 = vsel %vm83_vm4, %v77_v39, %v94_v47  ;;  %v88_v50 = vsel %vm82_vm3, %v85_v41, %v87_v45 }
  0x31   :  { %v92_v51 = vsel %vm82_vm3, %v89_v43, %v91_v48  ;;  %v96_v52 = vsel %vm82_vm3, %v93_v44, %v95_v49  ;;  %v104_v57 = vmul.u32 %v97_v35, %v88_v50 }
  0x32   :  { %v294_v53 = vmul.u32.u64.low %v97_v35, %v96_v52  ;;  %v295_v54 = vmul.u32.u64.high %v97_v35, %v96_v52, %v294_v53  ;;  %v297_v55 = vmul.u32.u64.low %v97_v35, %v92_v51  ;;  %v298_v56 = vmul.u32.u64.high %v97_v35, %v92_v51, %v297_v55 }
  0x34   :  { %vm106_vm5 = vc.u32 %v295_v54, %v297_v55  ;;  %v107_v58 = vadd.s32 1, %v298_v56  ;;  %v105_v5 = vadd.s32 %v297_v55, %v295_v54 }
  0x36   :  { %v108_v59 = vsel %vm106_vm5, %v107_v58, %v298_v56 }
  0x37   :  { %v109_v60 = vadd.s32 %v108_v59, %v104_v57 }
  0x39   :  { %v110_v61 = vadd.s32 536870912, %v109_v60 }
  0x3b   :  { %v111_v62 = vshrl.u32 %v110_v61, 30 }
  0x3d   :  { %v112_v63 = vshll.u32 %v111_v62, 30  ;;  %v135_v19 = vsub.s32 4, %v111_v62 }
  0x3f   :  { %v113_v0 = vsub.s32 %v109_v60, %v112_v63  ;;  %v136_v22 = vsel %vm51_vm7, %v135_v19, %v111_v62 }
  0x40   :  { %v138_v25 = vsel %vm50_vm8, 0, %v136_v22 }
  0x41   :  { %v115_v1 = vsub.s32 0, %v113_v0  ;;  %v142_v26 = vadd.s32 3, %v138_v25 }
  0x43   :  { %v175_v2 = vmin.u32 %v115_v1, %v113_v0  ;;  %v143_v27 = vand.u32 3, %v142_v26 }
  0x45   :  { %v117_v3 = vclz %v175_v2  ;;  %vm148_vm9 = vcmp.eq.s32.totalorder %v143_v27, 2  ;;  %vm145_vm10 = vcmp.eq.s32.totalorder %v143_v27, 0  ;;  %vm144_vm11 = vcmp.lt.s32.totalorder %v143_v27, 2 }
  0x47   :  { %v176_v4 = vadd.s32 4294967294, %v117_v3 }
  0x49   :  { %vm177_vm6 = vcmp.lt.s32.totalorder %v176_v4, 0 }
  0x4a   :  { %v120_v7 = vsel %vm177_vm6, 0, %v176_v4 }
  0x4b   :  { %v121_v8 = vsub.s32 32, %v120_v7  ;;  %v122_v10 = vshll.u32 %v113_v0, %v120_v7  ;;  %v125_v11 = vsub.s32 4294967266, %v120_v7 }
  0x4d   :  { %v123_v12 = vshrl.u32 %v105_v5, %v121_v8  ;;  %v126_v13 = vadd.s32 127, %v125_v11 }
  0x4f   :  { %v124_v14 = vor.u32 %v123_v12, %v122_v10  ;;  %v127_v15 = vshll.u32 %v126_v13, 23 }
  0x51   :  { %v128_v16 = vor.u32 4788187, %v127_v15  ;;  %v131_v17 = vcvt.s32.f32 %v124_v14 }
  0x53   :  { %v129_v18 = vand.u32 2147483647, %v128_v16 }
  0x55   :  { %v132_v20 = vmul.f32 %v131_v17, %v129_v18 }
  0x57   :  { %v133_v21 = vxor.u32 2147483648, %v132_v20 }
  0x59   :  { %v134_v23 = vsel %vm51_vm7, %v133_v21, %v132_v20 }
  0x5a   :  { %v137_v24 = vsel %vm50_vm8, %v288_v6, %v134_v23 }
  0x5b   :  { %190 = vcosq.f32 %v137_v24 }
  0x5c   :  { %192 = vsinq.f32 %v137_v24 }
  0x65   :  { %v191_v28 = vpop.eup %190 }
  0x66   :  { %v193_v29 = vpop.eup %192  ;;  %v149_v30 = vxor.u32 2147483648, %v191_v28 }
  0x67   :  { %v146_v31 = vxor.u32 2147483648, %v193_v29 }
  0x68   :  { %v150_v9 = vsel %vm148_vm9, %v149_v30, %v193_v29 }
  0x69   :  { %v147_v32 = vsel %vm145_vm10, %v191_v28, %v146_v31 }
  0x6a   :  { %v151_v34 = vsel %vm144_vm11, %v147_v32, %v150_v9 }
  0x6b   :  { %v152_v35 = vsel %vm141_vm12, nan, %v151_v34 }
  0x6c   :  { %v154_v36 = vadd.f32 %v153_v33, %v152_v35 }
  0x6e   :  { %156 = vst.msk [vmem:[#allocation5] sm:$0xff] %vm155_vm13, %v154_v36 }
  0x6f   :  { %227 = shalt.err (!%p224_p12)
}
  0x70   :  { %s228_s30 = scalar_lea.hbm %s324_s3, 128 }
  0x71   :  { %p229_p13 = scmp.ne.s32.totalorder %s324_s3, %s228_s30  ;;  %p232_p0 = scmp.lt.u32.totalorder %s228_s30, %s324_s3 }
  0x73   :  { %p234_p1 = pnand %p232_p0, %p229_p13 }
  0x75   :  { %237 = shalt.err (!%p234_p1)
}
  0x76   :  { %166 = dma.vmem_to_hbm [thread:$0]  %s164_s1, 128, %s324_s3, [#allocation4]  }
  0x77   :  { %240 = dma.done.wait [#allocation4], 128  }
  0x78   :  { %241 = vsyncadd [#allocation4], 4294967168 }
  0x79   :  { %170 = vsyncpa [#allocation3], 1 }
  0x7a   :  { %171 = vsyncpa [#allocation4], 1 }

</bundles_post_ra>
